<compile_context>
chip_gen: v6e
topology: v6e:2x2x1
jax: 0.10.0
libtpu: 0.0.40
codegen_flags: <defaults>
</compile_context>

<pallas_src>
import functools
import math

import jax
import jax.numpy as jnp
from jax import lax
from jax.experimental import pallas as pl
from jax.experimental.pallas import tpu as pltpu


def _round_up(x, m):
    return ((x + m - 1) // m) * m


# ---------------------------------------------------------------------------
# Fused decoder kernel: one batch tile per grid step, all weights resident.
# ---------------------------------------------------------------------------
def _fused_decoder_kernel(*refs, layer_cfg, eps, slope, use_tanh):
    """refs = (inp_ref, <per-layer parameter refs...>, out_ref).

    layer_cfg is a static tuple of (kind, use_ln, cat) with
      kind in {"hidden", "quad"}, cat in {None, "latent", "xyz"}.
    Hidden layers consume 4 refs (w, b, ln_g, ln_b); the quad layer consumes 3
    (w_lin, b_lin, w2 flattened to (I, O*J)).
    """
    inp_ref = refs[0]
    out_ref = refs[-1]
    param_refs = refs[1:-1]

    inp = inp_ref[...].astype(jnp.float32)
    need_xyz = any(cat == "xyz" for _, _, cat in layer_cfg)
    xyz = inp[:, -3:] if need_xyz else None

    x = inp
    p = 0
    for kind, use_ln, cat in layer_cfg:
        if cat == "latent":
            x = jnp.concatenate([x, inp], axis=1)
        elif cat == "xyz":
            x = jnp.concatenate([x, xyz], axis=1)

        if kind == "hidden":
            w = param_refs[p][...]
            b = param_refs[p + 1][...]
            g = param_refs[p + 2][...]
            beta = param_refs[p + 3][...]
            p += 4
            # MXU matmul: operands in the (possibly bf16) storage dtype, f32 acc.
            y = jnp.dot(x.astype(w.dtype), w,
                        preferred_element_type=jnp.float32) + b
            if use_ln:
                mean = jnp.mean(y, axis=-1, keepdims=True)
                var = jnp.mean(jnp.square(y - mean), axis=-1, keepdims=True)
                y = (y - mean) * lax.rsqrt(var + eps)
                y = y * g + beta
            x = jnp.where(y > 0, y, slope * y)        # LeakyReLU (f32, VPU)
        else:  # "quad" — QuadraticLayer output layer
            w_lin = param_refs[p][...]
            b_lin = param_refs[p + 1][...]
            w2 = param_refs[p + 2][...]                # (I, O*J), J == I
            p += 3
            in_dim = x.shape[1]
            out_dim = w_lin.shape[1]
            lin = jnp.dot(x, w_lin, preferred_element_type=jnp.float32) + b_lin
            # z[b, o*J + j] = sum_i x[b,i] * W_quad[i,o,j]  — one wide MXU op.
            z = jnp.dot(x.astype(w2.dtype), w2,
                        preferred_element_type=jnp.float32)
            if out_dim == 1:
                quad = jnp.sum(z * x, axis=-1, keepdims=True)
            else:
                # Static per-o J-wide slices + lane reductions (no iota selector,
                # no rank-3 reshape).
                parts = [jnp.sum(z[:, o * in_dim:(o + 1) * in_dim] * x,
                                 axis=-1, keepdims=True)
                         for o in range(out_dim)]
                quad = jnp.concatenate(parts, axis=1)
            y = lin + quad
            if use_tanh:
                y = jnp.tanh(y)
            x = y

    out_ref[...] = x.astype(out_ref.dtype)


def decoder_forward(params, inp, dims_full, *, latent_in=(), norm_layers=(),
                    xyz_in_all=False, use_tanh=False, batch_tile=128,
                    matmul_dtype=jnp.bfloat16, eps=1e-5, slope=0.01):
    """Pallas-backed Decoder.forward (eval mode; weight_norm=False path).

    matmul_dtype: storage/streaming dtype of the MXU weight operands (default
    bf16, accumulation always f32).  Set jnp.float32 for bit-accurate checks.
    """
    num_layers = len(dims_full)
    batch, d0 = inp.shape
    assert d0 == dims_full[0]

    # --- batch tiling: TB rows per grid step; axis marked "parallel" ---------
    tb = min(_round_up(batch_tile, 8), _round_up(batch, 8))
    b_pad = _round_up(batch, tb)
    inp_p = inp.astype(jnp.float32)
    if b_pad != batch:
        inp_p = jnp.pad(inp_p, ((0, b_pad - batch), (0, 0)))

    flat_inputs = [inp_p]
    in_specs = [pl.BlockSpec((tb, d0), lambda b: (b, 0))]
    layer_cfg = []
    final_out = 1

    def resident(arr):
        # Full-array block, same for every batch tile -> stays in VMEM.
        flat_inputs.append(arr)
        in_specs.append(pl.BlockSpec(arr.shape, lambda b: (0, 0)))

    for layer in range(num_layers - 1):
        p = params[f"lin{layer}"]
        if layer in latent_in:
            cat = "latent"
        elif layer != 0 and xyz_in_all:
            cat = "xyz"
        else:
            cat = None
        in_dim, out_dim = p["w"].shape
        if layer != num_layers - 2:
            resident(p["w"].astype(matmul_dtype))
            resident(p["b"].reshape(1, out_dim).astype(jnp.float32))
            resident(p["ln_g"].reshape(1, out_dim).astype(jnp.float32))
            resident(p["ln_b"].reshape(1, out_dim).astype(jnp.float32))
            layer_cfg.append(("hidden", layer in norm_layers, cat))
        else:
            # One-time host-side layout prep: W2[i, o*J + j] = W_quad[i, o, j].
            w2 = p["w_quad"].reshape(in_dim, out_dim * in_dim).astype(matmul_dtype)
            resident(p["w"].astype(jnp.float32))
            resident(p["b"].reshape(1, out_dim).astype(jnp.float32))
            resident(w2)
            layer_cfg.append(("quad", False, cat))
            final_out = out_dim

    kernel = functools.partial(
        _fused_decoder_kernel, layer_cfg=tuple(layer_cfg), eps=eps,
        slope=slope, use_tanh=use_tanh)

    out = pl.pallas_call(
        kernel,
        out_shape=jax.ShapeDtypeStruct((b_pad, final_out), jnp.float32),
        grid_spec=pltpu.PrefetchScalarGridSpec(
            num_scalar_prefetch=0,
            grid=(b_pad // tb,),
            in_specs=in_specs,
            out_specs=pl.BlockSpec((tb, final_out), lambda b: (b, 0)),
        ),
        compiler_params=pltpu.CompilerParams(
            # Batch-tile axis is embarrassingly parallel -> both TCs on v7x.
            dimension_semantics=("parallel",),
        ),
    )(*flat_inputs)
    return out[:batch]


# ---------------------------------------------------------------------------
# Parameter init + pure-JAX reference
# ---------------------------------------------------------------------------
def init_decoder_params(key, latent_size, dims, *, latent_in=(), xyz_in_all=False):
    dims_full = [latent_size + 3] + list(dims) + [1]
    num_layers = len(dims_full)
    params = {}
    for layer in range(num_layers - 1):
        if layer + 1 in latent_in:
            out_dim = dims_full[layer + 1] - dims_full[0]
        else:
            out_dim = dims_full[layer + 1]
            if xyz_in_all and layer != num_layers - 2:
                out_dim -= 3
        in_dim = dims_full[layer]
        key, k1, k2, k3 = jax.random.split(key, 4)
        bound = 1.0 / math.sqrt(in_dim)
        p = {
            "w": jax.random.uniform(k1, (in_dim, out_dim), minval=-bound,
                                    maxval=bound, dtype=jnp.float32),
            "b": jax.random.uniform(k2, (out_dim,), minval=-bound,
                                    maxval=bound, dtype=jnp.float32),
            "ln_g": jnp.ones((out_dim,), jnp.float32),
            "ln_b": jnp.zeros((out_dim,), jnp.float32),
        }
        if layer == num_layers - 2:
            # QuadraticLayer quad_weights (in, out, in), kaiming_uniform(a=sqrt(5))
            qbound = 1.0 / math.sqrt(out_dim * in_dim)
            p["w_quad"] = jax.random.uniform(
                k3, (in_dim, out_dim, in_dim), minval=-qbound, maxval=qbound,
                dtype=jnp.float32)
        params[f"lin{layer}"] = p
    return params, dims_full


def decoder_reference(params, inp, dims_full, *, latent_in=(), norm_layers=(),
                      xyz_in_all=False, use_tanh=False, eps=1e-5, slope=0.01):
    hp = jax.lax.Precision.HIGHEST
    num_layers = len(dims_full)
    xyz = inp[:, -3:]
    x = inp
    for layer in range(num_layers - 1):
        p = params[f"lin{layer}"]
        if layer in latent_in:
            x = jnp.concatenate([x, inp], axis=1)
        elif layer != 0 and xyz_in_all:
            x = jnp.concatenate([x, xyz], axis=1)
        if layer != num_layers - 2:
            y = jnp.dot(x, p["w"], precision=hp) + p["b"][None, :]
            if layer in norm_layers:
                mean = jnp.mean(y, axis=-1, keepdims=True)
                var = jnp.mean(jnp.square(y - mean), axis=-1, keepdims=True)
                y = (y - mean) / jnp.sqrt(var + eps)
                y = y * p["ln_g"][None, :] + p["ln_b"][None, :]
            x = jnp.where(y > 0, y, slope * y)
        else:
            lin = jnp.dot(x, p["w"], precision=hp) + p["b"][None, :]
            quad = jnp.einsum("bi,ioj,bj->bo", x, p["w_quad"], x, precision=hp)
            x = lin + quad
            if use_tanh:
                x = jnp.tanh(x)
    return x


if __name__ == "__main__":
    key = jax.random.PRNGKey(0)

    # ---------- Test A/B: small decoder, single batch tile ----------
    latent_size = 29                       # input dim = latent + 3 = 32
    dims = [64, 64]                        # dims_full = [32, 64, 64, 1]
    norm_layers = (0, 1)
    key, kin, kp = jax.random.split(key, 3)
    inp = jax.random.normal(kin, (8, latent_size + 3), dtype=jnp.float32)
    params, dims_full = init_decoder_params(kp, latent_size, dims)
    ref = decoder_reference(params, inp, dims_full, norm_layers=norm_layers)

    # (A) f32 MXU operands — tight check of the fused kernel.
    out_f32 = jax.block_until_ready(decoder_forward(
        params, inp, dims_full, norm_layers=norm_layers,
        matmul_dtype=jnp.float32))
    assert out_f32.shape == (8, 1)
    assert jnp.allclose(out_f32, ref, atol=2e-3, rtol=2e-3), (
        f"f32 max abs err {float(jnp.max(jnp.abs(out_f32 - ref)))}")

    # (B) default bf16 MXU operands, f32 accumulation — loosened tolerance.
    out_bf16 = jax.block_until_ready(decoder_forward(
        params, inp, dims_full, norm_layers=norm_layers))
    assert jnp.allclose(out_bf16, ref, atol=5e-2, rtol=5e-2), (
        f"bf16 max abs err {float(jnp.max(jnp.abs(out_bf16 - ref)))}")

    # ---------- Test C: lane-dense widths + batch tiling (2 parallel steps) ----------
    latent_size2 = 125                     # input dim = 128
    dims2 = [128, 128, 128]
    norm2 = (0, 1, 2)
    key, kin2, kp2 = jax.random.split(key, 3)
    inp2 = jax.random.normal(kin2, (200, latent_size2 + 3), dtype=jnp.float32)
    params2, dims_full2 = init_decoder_params(kp2, latent_size2, dims2)
    ref2 = decoder_reference(params2, inp2, dims_full2, norm_layers=norm2)
    out2 = jax.block_until_ready(decoder_forward(
        params2, inp2, dims_full2, norm_layers=norm2,
        matmul_dtype=jnp.float32, batch_tile=128))
    assert out2.shape == (200, 1)
    assert jnp.allclose(out2, ref2, atol=5e-3, rtol=5e-3), (
        f"tiled max abs err {float(jnp.max(jnp.abs(out2 - ref2)))}")

    print("KERNEL_OK")
</pallas_src>

<mosaic_0001>
module attributes {stable_mosaic.version = 11 : i64} {
  func.func @_fused_decoder_kernel(%arg0: i32, %arg1: memref<8x32xf32, #tpu.memory_space<vmem>>, %arg2: memref<32x64xf32, #tpu.memory_space<vmem>>, %arg3: memref<1x64xf32, #tpu.memory_space<vmem>>, %arg4: memref<1x64xf32, #tpu.memory_space<vmem>>, %arg5: memref<1x64xf32, #tpu.memory_space<vmem>>, %arg6: memref<64x64xf32, #tpu.memory_space<vmem>>, %arg7: memref<1x64xf32, #tpu.memory_space<vmem>>, %arg8: memref<1x64xf32, #tpu.memory_space<vmem>>, %arg9: memref<1x64xf32, #tpu.memory_space<vmem>>, %arg10: memref<64x1xf32, #tpu.memory_space<vmem>>, %arg11: memref<1x1xf32, #tpu.memory_space<vmem>>, %arg12: memref<64x64xf32, #tpu.memory_space<vmem>>, %arg13: memref<8x1xf32, #tpu.memory_space<vmem>>) attributes {dimension_semantics = [#tpu.dimension_semantics<parallel>], iteration_bounds = array<i64: 1>, scalar_prefetch = 0 : i64, scratch_operands = 0 : i64, tpu.core_type = #tpu.core_type<tc>, window_params = [{transform_indices = @transform_0, window_bounds = array<i64: 8, 32>}, {pipeline_mode = #tpu.pipeline_mode<synchronous>, transform_indices = @transform_1, window_bounds = array<i64: 32, 64>}, {pipeline_mode = #tpu.pipeline_mode<synchronous>, transform_indices = @transform_2, window_bounds = array<i64: 1, 64>}, {pipeline_mode = #tpu.pipeline_mode<synchronous>, transform_indices = @transform_3, window_bounds = array<i64: 1, 64>}, {pipeline_mode = #tpu.pipeline_mode<synchronous>, transform_indices = @transform_4, window_bounds = array<i64: 1, 64>}, {pipeline_mode = #tpu.pipeline_mode<synchronous>, transform_indices = @transform_5, window_bounds = array<i64: 64, 64>}, {pipeline_mode = #tpu.pipeline_mode<synchronous>, transform_indices = @transform_6, window_bounds = array<i64: 1, 64>}, {pipeline_mode = #tpu.pipeline_mode<synchronous>, transform_indices = @transform_7, window_bounds = array<i64: 1, 64>}, {pipeline_mode = #tpu.pipeline_mode<synchronous>, transform_indices = @transform_8, window_bounds = array<i64: 1, 64>}, {pipeline_mode = #tpu.pipeline_mode<synchronous>, transform_indices = @transform_9, window_bounds = array<i64: 64, 1>}, {pipeline_mode = #tpu.pipeline_mode<synchronous>, transform_indices = @transform_10, window_bounds = array<i64: 1, 1>}, {pipeline_mode = #tpu.pipeline_mode<synchronous>, transform_indices = @transform_11, window_bounds = array<i64: 64, 64>}, {transform_indices = @transform_12, window_bounds = array<i64: 8, 1>}]} {
    %c0 = arith.constant 0 : index
    %c0_0 = arith.constant 0 : index
    %0 = vector.load %arg1[%c0, %c0_0] : memref<8x32xf32, #tpu.memory_space<vmem>>, vector<8x32xf32>
    %c0_1 = arith.constant 0 : index
    %c0_2 = arith.constant 0 : index
    %1 = vector.load %arg2[%c0_1, %c0_2] : memref<32x64xf32, #tpu.memory_space<vmem>>, vector<32x64xf32>
    %c0_3 = arith.constant 0 : index
    %c0_4 = arith.constant 0 : index
    %2 = vector.load %arg3[%c0_3, %c0_4] : memref<1x64xf32, #tpu.memory_space<vmem>>, vector<1x64xf32>
    %c0_5 = arith.constant 0 : index
    %c0_6 = arith.constant 0 : index
    %3 = vector.load %arg4[%c0_5, %c0_6] : memref<1x64xf32, #tpu.memory_space<vmem>>, vector<1x64xf32>
    %c0_7 = arith.constant 0 : index
    %c0_8 = arith.constant 0 : index
    %4 = vector.load %arg5[%c0_7, %c0_8] : memref<1x64xf32, #tpu.memory_space<vmem>>, vector<1x64xf32>
    %cst = arith.constant dense<0.000000e+00> : vector<8x64xf32>
    %5 = tpu.matmul %0, %1, %cst {dimension_numbers = #tpu.dot_dimension_numbers<[1], [0], [0], [1], [0, 0, 1, 1], [], []>} : vector<8x32xf32>, vector<32x64xf32>, vector<8x64xf32> -> vector<8x64xf32>
    %6 = vector.broadcast %2 : vector<1x64xf32> to vector<8x64xf32>
    %7 = arith.addf %5, %6 : vector<8x64xf32>
    %cst_9 = arith.constant dense<0.000000e+00> : vector<8xf32>
    %8 = vector.multi_reduction <add>, %7, %cst_9 [1] : vector<8x64xf32> to vector<8xf32>
    %9 = vector.shape_cast %8 : vector<8xf32> to vector<8x1xf32>
    %cst_10 = arith.constant 6.400000e+01 : f32
    %10 = vector.broadcast %cst_10 : f32 to vector<8x1xf32>
    %11 = arith.divf %9, %10 : vector<8x1xf32>
    %12 = vector.broadcast %11 : vector<8x1xf32> to vector<8x64xf32>
    %13 = arith.subf %7, %12 : vector<8x64xf32>
    %14 = arith.mulf %13, %13 : vector<8x64xf32>
    %cst_11 = arith.constant dense<0.000000e+00> : vector<8xf32>
    %15 = vector.multi_reduction <add>, %14, %cst_11 [1] : vector<8x64xf32> to vector<8xf32>
    %16 = vector.shape_cast %15 : vector<8xf32> to vector<8x1xf32>
    %cst_12 = arith.constant 6.400000e+01 : f32
    %17 = vector.broadcast %cst_12 : f32 to vector<8x1xf32>
    %18 = arith.divf %16, %17 : vector<8x1xf32>
    %19 = vector.broadcast %11 : vector<8x1xf32> to vector<8x64xf32>
    %20 = arith.subf %7, %19 : vector<8x64xf32>
    %cst_13 = arith.constant 9.99999974E-6 : f32
    %21 = vector.broadcast %cst_13 : f32 to vector<8x1xf32>
    %22 = arith.addf %18, %21 : vector<8x1xf32>
    %23 = math.rsqrt %22 : vector<8x1xf32>
    %24 = vector.broadcast %23 : vector<8x1xf32> to vector<8x64xf32>
    %25 = arith.mulf %20, %24 : vector<8x64xf32>
    %26 = vector.broadcast %3 : vector<1x64xf32> to vector<8x64xf32>
    %27 = arith.mulf %25, %26 : vector<8x64xf32>
    %28 = vector.broadcast %4 : vector<1x64xf32> to vector<8x64xf32>
    %29 = arith.addf %27, %28 : vector<8x64xf32>
    %cst_14 = arith.constant 0.000000e+00 : f32
    %30 = vector.broadcast %cst_14 : f32 to vector<8x64xf32>
    %31 = arith.cmpf ogt, %29, %30 : vector<8x64xf32>
    %cst_15 = arith.constant 0.00999999977 : f32
    %32 = vector.broadcast %cst_15 : f32 to vector<8x64xf32>
    %33 = arith.mulf %32, %29 : vector<8x64xf32>
    %34 = arith.select %31, %29, %33 : vector<8x64xi1>, vector<8x64xf32>
    %c0_16 = arith.constant 0 : index
    %c0_17 = arith.constant 0 : index
    %35 = vector.load %arg6[%c0_16, %c0_17] : memref<64x64xf32, #tpu.memory_space<vmem>>, vector<64x64xf32>
    %c0_18 = arith.constant 0 : index
    %c0_19 = arith.constant 0 : index
    %36 = vector.load %arg7[%c0_18, %c0_19] : memref<1x64xf32, #tpu.memory_space<vmem>>, vector<1x64xf32>
    %c0_20 = arith.constant 0 : index
    %c0_21 = arith.constant 0 : index
    %37 = vector.load %arg8[%c0_20, %c0_21] : memref<1x64xf32, #tpu.memory_space<vmem>>, vector<1x64xf32>
    %c0_22 = arith.constant 0 : index
    %c0_23 = arith.constant 0 : index
    %38 = vector.load %arg9[%c0_22, %c0_23] : memref<1x64xf32, #tpu.memory_space<vmem>>, vector<1x64xf32>
    %cst_24 = arith.constant dense<0.000000e+00> : vector<8x64xf32>
    %39 = tpu.matmul %34, %35, %cst_24 {dimension_numbers = #tpu.dot_dimension_numbers<[1], [0], [0], [1], [0, 0, 1, 1], [], []>} : vector<8x64xf32>, vector<64x64xf32>, vector<8x64xf32> -> vector<8x64xf32>
    %40 = vector.broadcast %36 : vector<1x64xf32> to vector<8x64xf32>
    %41 = arith.addf %39, %40 : vector<8x64xf32>
    %cst_25 = arith.constant dense<0.000000e+00> : vector<8xf32>
    %42 = vector.multi_reduction <add>, %41, %cst_25 [1] : vector<8x64xf32> to vector<8xf32>
    %43 = vector.shape_cast %42 : vector<8xf32> to vector<8x1xf32>
    %cst_26 = arith.constant 6.400000e+01 : f32
    %44 = vector.broadcast %cst_26 : f32 to vector<8x1xf32>
    %45 = arith.divf %43, %44 : vector<8x1xf32>
    %46 = vector.broadcast %45 : vector<8x1xf32> to vector<8x64xf32>
    %47 = arith.subf %41, %46 : vector<8x64xf32>
    %48 = arith.mulf %47, %47 : vector<8x64xf32>
    %cst_27 = arith.constant dense<0.000000e+00> : vector<8xf32>
    %49 = vector.multi_reduction <add>, %48, %cst_27 [1] : vector<8x64xf32> to vector<8xf32>
    %50 = vector.shape_cast %49 : vector<8xf32> to vector<8x1xf32>
    %cst_28 = arith.constant 6.400000e+01 : f32
    %51 = vector.broadcast %cst_28 : f32 to vector<8x1xf32>
    %52 = arith.divf %50, %51 : vector<8x1xf32>
    %53 = vector.broadcast %45 : vector<8x1xf32> to vector<8x64xf32>
    %54 = arith.subf %41, %53 : vector<8x64xf32>
    %cst_29 = arith.constant 9.99999974E-6 : f32
    %55 = vector.broadcast %cst_29 : f32 to vector<8x1xf32>
    %56 = arith.addf %52, %55 : vector<8x1xf32>
    %57 = math.rsqrt %56 : vector<8x1xf32>
    %58 = vector.broadcast %57 : vector<8x1xf32> to vector<8x64xf32>
    %59 = arith.mulf %54, %58 : vector<8x64xf32>
    %60 = vector.broadcast %37 : vector<1x64xf32> to vector<8x64xf32>
    %61 = arith.mulf %59, %60 : vector<8x64xf32>
    %62 = vector.broadcast %38 : vector<1x64xf32> to vector<8x64xf32>
    %63 = arith.addf %61, %62 : vector<8x64xf32>
    %cst_30 = arith.constant 0.000000e+00 : f32
    %64 = vector.broadcast %cst_30 : f32 to vector<8x64xf32>
    %65 = arith.cmpf ogt, %63, %64 : vector<8x64xf32>
    %cst_31 = arith.constant 0.00999999977 : f32
    %66 = vector.broadcast %cst_31 : f32 to vector<8x64xf32>
    %67 = arith.mulf %66, %63 : vector<8x64xf32>
    %68 = arith.select %65, %63, %67 : vector<8x64xi1>, vector<8x64xf32>
    %c0_32 = arith.constant 0 : index
    %c0_33 = arith.constant 0 : index
    %69 = vector.load %arg10[%c0_32, %c0_33] : memref<64x1xf32, #tpu.memory_space<vmem>>, vector<64x1xf32>
    %c0_34 = arith.constant 0 : index
    %c0_35 = arith.constant 0 : index
    %70 = vector.load %arg11[%c0_34, %c0_35] : memref<1x1xf32, #tpu.memory_space<vmem>>, vector<1x1xf32>
    %c0_36 = arith.constant 0 : index
    %c0_37 = arith.constant 0 : index
    %71 = vector.load %arg12[%c0_36, %c0_37] : memref<64x64xf32, #tpu.memory_space<vmem>>, vector<64x64xf32>
    %cst_38 = arith.constant dense<0.000000e+00> : vector<8x1xf32>
    %72 = tpu.matmul %68, %69, %cst_38 {dimension_numbers = #tpu.dot_dimension_numbers<[1], [0], [0], [1], [0, 0, 1, 1], [], []>} : vector<8x64xf32>, vector<64x1xf32>, vector<8x1xf32> -> vector<8x1xf32>
    %73 = vector.broadcast %70 : vector<1x1xf32> to vector<8x1xf32>
    %74 = arith.addf %72, %73 : vector<8x1xf32>
    %cst_39 = arith.constant dense<0.000000e+00> : vector<8x64xf32>
    %75 = tpu.matmul %68, %71, %cst_39 {dimension_numbers = #tpu.dot_dimension_numbers<[1], [0], [0], [1], [0, 0, 1, 1], [], []>} : vector<8x64xf32>, vector<64x64xf32>, vector<8x64xf32> -> vector<8x64xf32>
    %76 = arith.mulf %75, %68 : vector<8x64xf32>
    %cst_40 = arith.constant dense<0.000000e+00> : vector<8xf32>
    %77 = vector.multi_reduction <add>, %76, %cst_40 [1] : vector<8x64xf32> to vector<8xf32>
    %78 = vector.shape_cast %77 : vector<8xf32> to vector<8x1xf32>
    %79 = arith.addf %74, %78 : vector<8x1xf32>
    %c0_41 = arith.constant 0 : index
    %c0_42 = arith.constant 0 : index
    %80 = vector.load %arg13[%c0_41, %c0_42] : memref<8x1xf32, #tpu.memory_space<vmem>>, vector<8x1xf32>
    tpu.vector_store %arg13[%c0_41, %c0_42], %79 {strides = array<i32>} : memref<8x1xf32, #tpu.memory_space<vmem>>, vector<8x1xf32>,
    return
  }
  func.func @transform_0(%arg0: i32) -> (i32, i32) {
    %c0_i32 = arith.constant 0 : i32
    %c0_i32_0 = arith.constant 0 : i32
    return %arg0, %c0_i32 : i32, i32
  }
  func.func @transform_1(%arg0: i32) -> (i32, i32) {
    %c0_i32 = arith.constant 0 : i32
    %c0_i32_0 = arith.constant 0 : i32
    %c0_i32_1 = arith.constant 0 : i32
    return %c0_i32, %c0_i32_0 : i32, i32
  }
  func.func @transform_2(%arg0: i32) -> (i32, i32) {
    %c0_i32 = arith.constant 0 : i32
    %c0_i32_0 = arith.constant 0 : i32
    %c0_i32_1 = arith.constant 0 : i32
    return %c0_i32, %c0_i32_0 : i32, i32
  }
  func.func @transform_3(%arg0: i32) -> (i32, i32) {
    %c0_i32 = arith.constant 0 : i32
    %c0_i32_0 = arith.constant 0 : i32
    %c0_i32_1 = arith.constant 0 : i32
    return %c0_i32, %c0_i32_0 : i32, i32
  }
  func.func @transform_4(%arg0: i32) -> (i32, i32) {
    %c0_i32 = arith.constant 0 : i32
    %c0_i32_0 = arith.constant 0 : i32
    %c0_i32_1 = arith.constant 0 : i32
    return %c0_i32, %c0_i32_0 : i32, i32
  }
  func.func @transform_5(%arg0: i32) -> (i32, i32) {
    %c0_i32 = arith.constant 0 : i32
    %c0_i32_0 = arith.constant 0 : i32
    %c0_i32_1 = arith.constant 0 : i32
    return %c0_i32, %c0_i32_0 : i32, i32
  }
  func.func @transform_6(%arg0: i32) -> (i32, i32) {
    %c0_i32 = arith.constant 0 : i32
    %c0_i32_0 = arith.constant 0 : i32
    %c0_i32_1 = arith.constant 0 : i32
    return %c0_i32, %c0_i32_0 : i32, i32
  }
  func.func @transform_7(%arg0: i32) -> (i32, i32) {
    %c0_i32 = arith.constant 0 : i32
    %c0_i32_0 = arith.constant 0 : i32
    %c0_i32_1 = arith.constant 0 : i32
    return %c0_i32, %c0_i32_0 : i32, i32
  }
  func.func @transform_8(%arg0: i32) -> (i32, i32) {
    %c0_i32 = arith.constant 0 : i32
    %c0_i32_0 = arith.constant 0 : i32
    %c0_i32_1 = arith.constant 0 : i32
    return %c0_i32, %c0_i32_0 : i32, i32
  }
  func.func @transform_9(%arg0: i32) -> (i32, i32) {
    %c0_i32 = arith.constant 0 : i32
    %c0_i32_0 = arith.constant 0 : i32
    %c0_i32_1 = arith.constant 0 : i32
    return %c0_i32, %c0_i32_0 : i32, i32
  }
  func.func @transform_10(%arg0: i32) -> (i32, i32) {
    %c0_i32 = arith.constant 0 : i32
    %c0_i32_0 = arith.constant 0 : i32
    %c0_i32_1 = arith.constant 0 : i32
    return %c0_i32, %c0_i32_0 : i32, i32
  }
  func.func @transform_11(%arg0: i32) -> (i32, i32) {
    %c0_i32 = arith.constant 0 : i32
    %c0_i32_0 = arith.constant 0 : i32
    %c0_i32_1 = arith.constant 0 : i32
    return %c0_i32, %c0_i32_0 : i32, i32
  }
  func.func @transform_12(%arg0: i32) -> (i32, i32) {
    %c0_i32 = arith.constant 0 : i32
    %c0_i32_0 = arith.constant 0 : i32
    return %arg0, %c0_i32 : i32, i32
  }
}

</mosaic_0001>

<bundles_post_ra>
// kernel: tpu_custom_call.1
= control target key start
LH: loop header
LB: loop body
LE: loop exit
PB: predicated region body
PF: predicated region fallthrough
CT: control target
= control target key end

     0   :  { %s851_s0 = inlined_call_operand.vmem [shape: f32[8,32], index: 0, kind: input, shape index: {}]   ;;  %s852_s1 = inlined_call_operand.hbm [shape: f32[32,64], index: 1, kind: input, shape index: {}]   ;;  %s853_s2 = inlined_call_operand.vmem [shape: f32[1,64], index: 2, kind: input, shape index: {}]   ;;  %s854_s3 = inlined_call_operand.vmem [shape: f32[1,64], index: 3, kind: input, shape index: {}]   ;;  %s855_s4 = inlined_call_operand.vmem [shape: f32[1,64], index: 4, kind: input, shape index: {}]   ;;  %s856_s5 = inlined_call_operand.vmem [shape: f32[64,64], index: 5, kind: input, shape index: {}]   ;;  %s857_s6 = inlined_call_operand.vmem [shape: f32[1,64], index: 6, kind: input, shape index: {}]   ;;  %s858_s7 = inlined_call_operand.vmem [shape: f32[1,64], index: 7, kind: input, shape index: {}]   ;;  %s859_s8 = inlined_call_operand.vmem [shape: f32[1,64], index: 8, kind: input, shape index: {}]   ;;  %s860_s9 = inlined_call_operand.vmem [shape: f32[64,1], index: 9, kind: input, shape index: {}]   ;;  %s861_s10 = inlined_call_operand.<no memory space> [shape: f32[1,1], index: 10, kind: input, shape index: {}]   ;;  %s862_s11 = inlined_call_operand.hbm [shape: f32[64,64], index: 11, kind: input, shape index: {}]   ;;  %s863_s12 = inlined_call_operand.vmem [shape: f32[8,1], index: 12, kind: output, shape index: {}]  }
   0x1   :  { %v17_v0 = vstv %s861_s10 }
   0x2   :  { %18 = vst [vmem:[#allocation2] sm:$0x1] %v17_v0 }
   0x3   :  { %19 = vsyncpa [#allocation4], 0 }
   0x4   :  { %20 = vsyncpa [#allocation6], 0  ;;  %s655_s23 = smov [#allocation3]  }
   0x5   :  { %s28_s24 = sshll.u32 %s655_s23, 4  ;;  %s29_s24 = int_to_ptr.vmem [resolvable:$true] %s28_s24 }
   0x6   :  { %s619_s25 = scalar_lea.vmem %s29_s24, 512  ;;  %p624_p1 = scmp.lt.s32.totalorder %s29_s24, %s29_s24 }
   0x7   :  { %p620_p0 = scmp.ne.s32.totalorder %s29_s24, %s619_s25  ;;  %p625_p2 = scmp.lt.s32.totalorder %s619_s25, %s619_s25 }
   0x9   :  { %p626_p3 = por %p625_p2, %p624_p1 }
   0xb   :  { %p627_p4 = pnand %p626_p3, %p620_p0 }
   0xd   :  { %630 = shalt.err (!%p627_p4)
}
   0xe   :  { %s656_s26 = smov 128   ;;  %s657_s27 = smov 8  }
   0xf   :  { %34 = dma.hbm_to_vmem [thread:$0]  %s852_s1, 512, %s29_s24, [#allocation4], %s656_s26, %s656_s26, %s657_s27  }
  0x10   :  { %s658_s10 = smov [#allocation5]  }
  0x11   :  { %s58_s30 = sshll.u32 %s658_s10, 4  ;;  %s59_s30 = int_to_ptr.vmem [resolvable:$true] %s58_s30 }
  0x12   :  { %s639_s13 = scalar_lea.vmem %s59_s30, 1024  ;;  %p644_p6 = scmp.lt.s32.totalorder %s59_s30, %s59_s30 }
  0x13   :  { %p640_p5 = scmp.ne.s32.totalorder %s59_s30, %s639_s13  ;;  %p645_p7 = scmp.lt.s32.totalorder %s639_s13, %s639_s13 }
  0x15   :  { %p646_p8 = por %p645_p7, %p644_p6 }
  0x17   :  { %p647_p9 = pnand %p646_p8, %p640_p5 }
  0x19   :  { %650 = shalt.err (!%p647_p9)
}
  0x1a   :  { %64 = dma.hbm_to_vmem [thread:$0]  %s862_s11, 1024, %s59_s30, [#allocation6], %s656_s26, %s656_s26, %s657_s27  }
  0x1b   :  { %651 = dma.done.wait [#allocation4], 512  }
  0x1c   :  { %652 = vsyncadd [#allocation4], 4294966784 }
  0x1d   :  { %653 = dma.done.wait [#allocation6], 1024  }
  0x1e   :  { %654 = vsyncadd [#allocation6], 4294966272  ;;  %v659_v1 = vmov 0.0   ;;  %vm660_vm0 = vmmov 0   ;;  %v75_v2 = vld [vmem:[#allocation3 + $0x18] sm:$0xff]  ;;  %v74_v3 = vld [vmem:[#allocation3 + $0x10] sm:$0xff] }
  0x1f   :  { %533 = vmatprep.subr.mxu0 %v659_v1  ;;  %541 = vmatprep.mubr.msk.f32.mxu0 %vm660_vm0, %v659_v1  ;;  %v73_v4 = vld [vmem:[#allocation3 + $0x8] sm:$0xff]  ;;  %v72_v5 = vld [vmem:[#allocation3] sm:$0xff]  ;;  %vm85_vm1 = vcmask 261120   ;;  %v490_v7 = vld [vmem:[%s853_s2] ss:$0 sm:$0xff]  ;;  %vm159_vm2 = vcmask 523264  }
  0x20   :  { %544 = vmatprep.subr.mxu1 %v659_v1  ;;  %560 = vmatprep.mubr.msk.f32.mxu1 %vm660_vm0, %v659_v1  ;;  %v71_v6 = vld [vmem:[%s851_s0] sm:$0xff]  ;;  %v198_v17 = vld [vmem:[%s856_s5 + $0x38] sm:$0xff]  ;;  %v197_v18 = vld [vmem:[%s856_s5 + $0x30] sm:$0xff]  ;;  %vm482_vm5 = vcmask 7168  }
  0x21   :  { %534 = vmatpush3.msra.mxu0 %v75_v2  ;;  %545 = vmatpush3.msra.mxu1 %v198_v17  ;;  %v196_v19 = vld [vmem:[%s856_s5 + $0x28] sm:$0xff]  ;;  %v195_v20 = vld [vmem:[%s856_s5 + $0x20] sm:$0xff]  ;;  %v194_v21 = vld [vmem:[%s856_s5 + $0x18] sm:$0xff] }
  0x22   :  { %535 = vmatprep.subr.mxu0 %v659_v1  ;;  %546 = vmatprep.subr.mxu1 %v659_v1  ;;  %v193_v22 = vld [vmem:[%s856_s5 + $0x10] sm:$0xff]  ;;  %v192_v23 = vld [vmem:[%s856_s5 + $0x8] sm:$0xff]  ;;  %v191_v24 = vld [vmem:[%s856_s5] sm:$0xff] }
  0x23   :  { %536 = vmatpush3.msra.mxu0 %v74_v3  ;;  %547 = vmatpush3.msra.mxu1 %v197_v18  ;;  %v492_v29 = vld [vmem:[%s854_s3] ss:$0 sm:$0xff]  ;;  %v318_v46 = vld [vmem:[%s860_s9 + $0x38] sm:$0xff]  ;;  %v317_v48 = vld [vmem:[%s860_s9 + $0x30] sm:$0xff] }
  0x24   :  { %537 = vmatprep.subr.mxu0 %v659_v1  ;;  %548 = vmatprep.subr.mxu1 %v659_v1  ;;  %v493_v31 = vld [vmem:[%s855_s4] ss:$0 sm:$0xff]  ;;  %v326_v49 = vld [vmem:[#allocation5 + $0x30] sm:$0xff]  ;;  %v316_v50 = vld [vmem:[%s860_s9 + $0x28] sm:$0xff] }
  0x25   :  { %538 = vmatpush3.msra.mxu0 %v73_v4  ;;  %549 = vmatpush3.msra.mxu1 %v196_v19  ;;  %v494_v36 = vld [vmem:[%s857_s6] ss:$0 sm:$0xff]  ;;  %v325_v51 = vld [vmem:[#allocation5 + $0x28] sm:$0xff]  ;;  %v324_v53 = vld [vmem:[#allocation5 + $0x20] sm:$0xff] }
  0x26   :  { %539 = vmatprep.subr.mxu0 %v659_v1  ;;  %550 = vmatprep.subr.mxu1 %v659_v1  ;;  %v327_v47 = vld [vmem:[#allocation5 + $0x38] sm:$0xff]  ;;  %v313_v56 = vld [vmem:[%s860_s9 + $0x10] sm:$0xff]  ;;  %v312_v58 = vld [vmem:[%s860_s9 + $0x8] sm:$0xff] }
  0x27   :  { %540 = vmatpush3.msra.mxu0 %v72_v5  ;;  %551 = vmatpush3.msra.mxu1 %v195_v20  ;;  %v315_v52 = vld [vmem:[%s860_s9 + $0x20] sm:$0xff]  ;;  %v314_v54 = vld [vmem:[%s860_s9 + $0x18] sm:$0xff]  ;;  %v321_v59 = vld [vmem:[#allocation5 + $0x8] sm:$0xff] }
  0x28   :  { %542 = vmatmul.mubr.msk.f32.vlgmr.msra.gmra.mxu0 %vm85_vm1, %v71_v6  ;;  %563 = vmatprep.subr.mxu0 %v659_v1  ;;  %v323_v55 = vld [vmem:[#allocation5 + $0x18] sm:$0xff]  ;;  %v322_v57 = vld [vmem:[#allocation5 + $0x10] sm:$0xff]  ;;  %v320_v61 = vld [vmem:[#allocation5] sm:$0xff] }
  0x29   :  { %579 = vmatprep.mubr.msk.f32.mxu0 %vm660_vm0, %v659_v1  ;;  %552 = vmatprep.subr.mxu1 %v659_v1  ;;  %v311_v60 = vld [vmem:[%s860_s9] sm:$0xff] }
  0x2a   :  { %553 = vmatpush3.msra.mxu1 %v194_v21  ;;  %564 = vmatpush3.msra.mxu0 %v318_v46  ;;  %v496_v3 = vld [vmem:[%s858_s7] ss:$0 sm:$0xff] }
  0x2b   :  { %554 = vmatprep.subr.mxu1 %v659_v1  ;;  %565 = vmatprep.subr.mxu0 %v659_v1  ;;  %v497_v5 = vld [vmem:[%s859_s8] ss:$0 sm:$0xff] }
  0x2c   :  { %555 = vmatpush3.msra.mxu1 %v193_v22  ;;  %566 = vmatpush3.msra.mxu0 %v317_v48 }
  0x2d   :  { %556 = vmatprep.subr.mxu1 %v659_v1  ;;  %567 = vmatprep.subr.mxu0 %v659_v1 }
  0x2e   :  { %557 = vmatpush3.msra.mxu1 %v192_v23  ;;  %568 = vmatpush3.msra.mxu0 %v316_v50 }
  0x2f   :  { %558 = vmatprep.subr.mxu1 %v659_v1  ;;  %569 = vmatprep.subr.mxu0 %v659_v1 }
  0x30   :  { %559 = vmatpush3.msra.mxu1 %v191_v24  ;;  %570 = vmatpush3.msra.mxu0 %v315_v52 }
  0x31   :  { %582 = vmatprep.subr.mxu1 %v659_v1  ;;  %571 = vmatprep.subr.mxu0 %v659_v1 }
  0x32   :  { %572 = vmatpush3.msra.mxu0 %v314_v54 }
  0x33   :  { %573 = vmatprep.subr.mxu0 %v659_v1 }
  0x34   :  { %574 = vmatpush3.msra.mxu0 %v313_v56 }
  0x35   :  { %575 = vmatprep.subr.mxu0 %v659_v1 }
  0x36   :  { %576 = vmatpush3.msra.mxu0 %v312_v58 }
  0x37   :  { %577 = vmatprep.subr.mxu0 %v659_v1 }
  0x38   :  { %578 = vmatpush3.msra.mxu0 %v311_v60 }
  0xe8   :  { %v155_v8 = vpop.f32.mrf.mxu0 }
  0xe9   :  { %v156_v9 = vadd.f32 %v490_v7, %v155_v8 }
  0xea   :  { %v543_v10 = vpop.f32.mrf.mxu0 }
  0xeb   :  { %v160_v11 = vsel %vm159_vm2, %v156_v9, 0.0 }
  0xec   :  { %161 = vadd.xlane.f32.xlu0 %v160_v11 }
 0x175   :  { %v162_v12 = vpop.xlane.xlu0 %161 }
 0x176   :  { %v164_v13 = vmul.f32 0.015625, %v162_v12 }
 0x178   :  { %v165_v14 = vsub.f32 %v156_v9, %v164_v13 }
 0x17a   :  { %v166_v15 = vmul.f32 %v165_v14, %v165_v14 }
 0x17c   :  { %v167_v16 = vsel %vm159_vm2, %v166_v15, 0.0  ;;  %v498_v15 = vld [vmem:[#allocation2] ss:$0 sm:$0xff] }
 0x17d   :  { %168 = vadd.xlane.f32.xlu0 %v167_v16 }
 0x206   :  { %v169_v25 = vpop.xlane.xlu0 %168 }
 0x207   :  { %v170_v26 = vmul.f32 0.015625, %v169_v25 }
 0x209   :  { %v171_v27 = vadd.f32 1e-05, %v170_v26 }
 0x20b   :  { %607 = vrsqrt.f32 %v171_v27 }
 0x218   :  { %v608_v28 = vpop.eup %607 }
 0x219   :  { %v173_v30 = vmul.f32 %v608_v28, %v165_v14 }
 0x21b   :  { %v180_v32 = vmul.f32 %v492_v29, %v173_v30 }
 0x21d   :  { %v187_v33 = vadd.f32 %v493_v31, %v180_v32 }
 0x21f   :  { %vm188_vm3 = vcmp.gt.f32.partialorder %v187_v33, 0.0  ;;  %v189_v34 = vmul.f32 0.01, %v187_v33 }
 0x221   :  { %v190_v35 = vsel %vm188_vm3, %v187_v33, %v189_v34 }
 0x222   :  { %561 = vmatmul.mubr.msk.f32.vlgmr.msra.gmra.mxu1 %vm159_vm2, %v190_v35 }
 0x223   :  { %598 = vmatprep.mubr.msk.f32.mxu1 %vm660_vm0, %v659_v1  ;;  %583 = vmatpush3.msra.mxu1 %v327_v47 }
 0x224   :  { %584 = vmatprep.subr.mxu1 %v659_v1 }
 0x225   :  { %585 = vmatpush3.msra.mxu1 %v326_v49 }
 0x226   :  { %586 = vmatprep.subr.mxu1 %v659_v1 }
 0x227   :  { %587 = vmatpush3.msra.mxu1 %v325_v51 }
 0x228   :  { %588 = vmatprep.subr.mxu1 %v659_v1 }
 0x229   :  { %589 = vmatpush3.msra.mxu1 %v324_v53 }
 0x22a   :  { %590 = vmatprep.subr.mxu1 %v659_v1 }
 0x22b   :  { %591 = vmatpush3.msra.mxu1 %v323_v55 }
 0x22c   :  { %592 = vmatprep.subr.mxu1 %v659_v1 }
 0x22d   :  { %593 = vmatpush3.msra.mxu1 %v322_v57 }
 0x22e   :  { %594 = vmatprep.subr.mxu1 %v659_v1 }
 0x22f   :  { %595 = vmatpush3.msra.mxu1 %v321_v59 }
 0x230   :  { %596 = vmatprep.subr.mxu1 %v659_v1 }
 0x231   :  { %597 = vmatpush3.msra.mxu1 %v320_v61 }
 0x2e2   :  { %v277_v37 = vpop.f32.mrf.mxu1 }
 0x2e3   :  { %v278_v38 = vadd.f32 %v494_v36, %v277_v37 }
 0x2e4   :  { %v562_v39 = vpop.f32.mrf.mxu1 }
 0x2e5   :  { %v281_v40 = vsel %vm159_vm2, %v278_v38, 0.0 }
 0x2e6   :  { %282 = vadd.xlane.f32.xlu1 %v281_v40 }
 0x36f   :  { %v283_v41 = vpop.xlane.xlu1 %282 }
 0x370   :  { %v284_v42 = vmul.f32 0.015625, %v283_v41 }
 0x372   :  { %v285_v43 = vsub.f32 %v278_v38, %v284_v42 }
 0x374   :  { %v286_v44 = vmul.f32 %v285_v43, %v285_v43 }
 0x376   :  { %v287_v45 = vsel %vm159_vm2, %v286_v44, 0.0 }
 0x377   :  { %288 = vadd.xlane.f32.xlu1 %v287_v45 }
 0x400   :  { %v289_v62 = vpop.xlane.xlu1 %288 }
 0x401   :  { %v290_v63 = vmul.f32 0.015625, %v289_v62 }
 0x403   :  { %v291_v0 = vadd.f32 1e-05, %v290_v63 }
 0x405   :  { %609 = vrsqrt.f32 %v291_v0 }
 0x412   :  { %v610_v2 = vpop.eup %609 }
 0x413   :  { %v293_v4 = vmul.f32 %v610_v2, %v285_v43 }
 0x415   :  { %v300_v6 = vmul.f32 %v496_v3, %v293_v4 }
 0x417   :  { %v307_v7 = vadd.f32 %v497_v5, %v300_v6 }
 0x419   :  { %vm308_vm4 = vcmp.gt.f32.partialorder %v307_v7, 0.0  ;;  %v309_v1 = vmul.f32 0.01, %v307_v7 }
 0x41b   :  { %v310_v8 = vsel %vm308_vm4, %v307_v7, %v309_v1 }
 0x41c   :  { %580 = vmatmul.mubr.msk.f32.vlgmr.msra.gmra.mxu0 %vm159_vm2, %v310_v8  ;;  %599 = vmatmul.mubr.msk.f32.vlgmr.msra.gmra.mxu1 %vm159_vm2, %v310_v8 }
 0x4dc   :  { %v403_v9 = vpop.f32.mrf.mxu0  ;;  %v473_v10 = vpop.f32.mrf.mxu1 }
 0x4dd   :  { %v477_v11 = vmul.f32 %v473_v10, %v310_v8  ;;  %v404_v16 = vadd.f32 %v498_v15, %v403_v9 }
 0x4de   :  { %v581_v12 = vpop.f32.mrf.mxu0  ;;  %v600_v13 = vpop.f32.mrf.mxu1 }
 0x4df   :  { %v478_v14 = vsel %vm159_vm2, %v477_v11, 0.0 }
 0x4e0   :  { %479 = vadd.xlane.f32.xlu0 %v478_v14 }
 0x569   :  { %v480_v17 = vpop.xlane.xlu0 %479 }
 0x56a   :  { %v481_v18 = vadd.f32 %v480_v17, %v404_v16 }
 0x56c   :  { %483 = vst.msk [vmem:[%s863_s12] sm:$0xff] %vm482_vm5, %v481_v18 }
 0x56d   :  { %488 = vsyncpa [#allocation4], 1 }
 0x56e   :  { %489 = vsyncpa [#allocation6], 1 }

</bundles_post_ra>
